<compile_context>
chip_gen: v7x
topology: tpu7x:2x2x1
jax: 0.10.0
libtpu: 0.0.40
codegen_flags: <defaults>
</compile_context>

<pallas_src>
import functools

import jax
import jax.numpy as jnp
from jax.experimental import pallas as pl
from jax.experimental.pallas import tpu as pltpu


def _focal_loss_kernel(logits_ref, label_ref, sum_ref, cnt_ref, *,
                       alpha, gamma, ignore_lb, hw, tile_p):
    """Blocks: logits (C, TILE_P), label (1, TILE_P); outputs (1, TILE_P) partials."""
    j = pl.program_id(1)  # pixel-tile index (reduction axis, kept last in the grid)

    @pl.when(j == 0)
    def _():
        sum_ref[...] = jnp.zeros_like(sum_ref)
        cnt_ref[...] = jnp.zeros_like(cnt_ref)

    x = logits_ref[...].astype(jnp.float32)        # (C, TILE_P)
    lbl = label_ref[...]                           # (1, TILE_P) int32

    # Ragged tail handled in-kernel (trace-time gated: zero cost when HW % TILE_P == 0).
    if hw % tile_p != 0:
        pix = j * tile_p + jax.lax.broadcasted_iota(jnp.int32, (1, tile_p), 1)
        inb = pix < hw                             # (1, TILE_P)
        # Scrub out-of-bounds garbage so NaN/Inf lanes cannot poison the accumulators.
        x = jnp.where(inb, x, 0.0)
        valid = jnp.logical_and(lbl != ignore_lb, inb)
    else:
        valid = lbl != ignore_lb                   # (1, TILE_P)

    lbl_c = jnp.where(valid, lbl, 0)               # clamp ignored -> class 0 (like PyTorch)

    # Softmax over the channel (sublane) axis.
    m = jnp.max(x, axis=0, keepdims=True)          # (1, TILE_P)
    e = jnp.exp(x - m)                             # (C, TILE_P)
    denom = jnp.sum(e, axis=0, keepdims=True)      # (1, TILE_P)
    inv = pl.reciprocal(denom, approx=False)       # 1 reciprocal/pixel instead of C divides
    probs = e * inv                                # (C, TILE_P)

    c = x.shape[0]
    cls_iota = jax.lax.broadcasted_iota(jnp.int32, (c, tile_p), 0)
    is_t = cls_iota == lbl_c                       # (C, TILE_P) one-hot mask

    pt = jnp.where(is_t, probs, 1.0 - probs)
    alpha_w = jnp.where(is_t, alpha, 1.0 - alpha)

    # (1 - pt) ** gamma without pow for small integer gamma (avoids exp/log on EUP).
    u = 1.0 - pt
    g_int = int(gamma)
    if float(gamma) == float(g_int) and 0 <= g_int <= 4:
        focal = jnp.ones_like(u) if g_int == 0 else u
        for _ in range(max(g_int - 1, 0)):
            focal = focal * u
    else:
        focal = u ** jnp.float32(gamma)

    loss = -(alpha_w * focal) * jnp.log(pt + 1e-12)   # (C, TILE_P)

    valid_f = valid.astype(jnp.float32)               # (1, TILE_P)
    loss = loss * valid_f                              # zero all channels of ignored pixels

    # Lane-wise running accumulation into resident output blocks (no scalar reduce here).
    sum_ref[...] += jnp.sum(loss, axis=0, keepdims=True)
    cnt_ref[...] += valid_f


def _default_tile_p(hw, c, itemsize, max_tile=32768, budget_bytes=16 * 1024 * 1024):
    """Largest lane tile keeping double-buffered input blocks VMEM-safe (v7x too)."""
    t = max_tile
    # 2x (double buffer) * (logits block + int32 label block) per pixel lane.
    while t > 512 and 2 * t * (c * itemsize + 4) > budget_bytes:
        t //= 2
    hw_pad = ((hw + 127) // 128) * 128               # keep the lane dim a multiple of 128
    return max(128, min(t, hw_pad))


def focal_loss(logits, label, *, alpha=0.25, gamma=2.0, ignore_lb=255, tile_p=None):
    """logits: (N, C, H, W) float; label: (N, H, W) int.  Returns scalar mean focal loss."""
    n, c, h, w = logits.shape
    hw = h * w

    # Free views of the NCHW layout: channels on sublanes, pixels on lanes.
    x = logits.reshape(n, c, hw)                       # native dtype, no transpose/pad
    lbl = label.reshape(n, 1, hw).astype(jnp.int32)

    if tile_p is None:
        tile_p = _default_tile_p(hw, c, jnp.dtype(logits.dtype).itemsize)
    num_tiles = pl.cdiv(hw, tile_p)

    kernel = functools.partial(
        _focal_loss_kernel, alpha=float(alpha), gamma=float(gamma),
        ignore_lb=int(ignore_lb), hw=hw, tile_p=tile_p)

    sums, cnts = pl.pallas_call(
        kernel,
        out_shape=(
            jax.ShapeDtypeStruct((n, 1, tile_p), jnp.float32),  # per-batch lane-wise loss sums
            jax.ShapeDtypeStruct((n, 1, tile_p), jnp.float32),  # per-batch lane-wise valid counts
        ),
        grid_spec=pltpu.PrefetchScalarGridSpec(
            num_scalar_prefetch=0,
            grid=(n, num_tiles),
            in_specs=[
                pl.BlockSpec((None, c, tile_p), lambda b, j: (b, 0, j)),
                pl.BlockSpec((None, 1, tile_p), lambda b, j: (b, 0, j)),
            ],
            out_specs=[
                pl.BlockSpec((None, 1, tile_p), lambda b, j: (b, 0, 0)),
                pl.BlockSpec((None, 1, tile_p), lambda b, j: (b, 0, 0)),
            ],
        ),
        compiler_params=pltpu.CompilerParams(
            dimension_semantics=("parallel", "arbitrary")),
    )(x, lbl)

    # Tiny epilogue reduce (N * TILE_P elements each) done by XLA.
    return jnp.sum(sums) / jnp.sum(cnts)


def focal_loss_reference(logits, label, *, alpha=0.25, gamma=2.0, ignore_lb=255):
    """Pure-JAX reference mirroring the PyTorch forward (softmax + mean)."""
    valid = (label != ignore_lb)
    n_valid = valid.sum().astype(jnp.float32)
    lbl = jnp.where(valid, label, 0)
    probs = jax.nn.softmax(logits.astype(jnp.float32), axis=1)
    one_hot = jax.nn.one_hot(lbl, logits.shape[1], axis=1, dtype=jnp.float32)
    pt = jnp.where(one_hot == 1.0, probs, 1.0 - probs)
    alpha_w = alpha * one_hot + (1.0 - alpha) * (1.0 - one_hot)
    loss = -alpha_w * (1.0 - pt) ** gamma * jnp.log(pt + 1e-12)
    loss = loss * valid[:, None, :, :].astype(jnp.float32)
    return loss.sum() / n_valid


if __name__ == "__main__":
    key = jax.random.PRNGKey(0)
    k_logits, k_label = jax.random.split(key)

    N, C, H, W = 2, 4, 16, 16
    logits = jax.random.normal(k_logits, (N, C, H, W), dtype=jnp.float32)
    label = jax.random.randint(k_label, (N, H, W), 0, C, dtype=jnp.int32)
    # Mark some pixels as ignored to exercise the ignore_lb path.
    label = label.at[0, 0, :5].set(255)
    label = label.at[1, 3, 7:10].set(255)

    out = jax.block_until_ready(focal_loss(logits, label))

    ref = focal_loss_reference(logits, label)
    assert jnp.allclose(out, ref, rtol=1e-5, atol=1e-6), (out, ref)

    print("KERNEL_OK")
</pallas_src>

<mosaic_0001>
module attributes {stable_mosaic.version = 11 : i64} {
  func.func @_focal_loss_kernel(%arg0: i32, %arg1: i32, %arg2: memref<1x4x256xf32, #tpu.memory_space<vmem>>, %arg3: memref<1x1x256xi32, #tpu.memory_space<vmem>>, %arg4: memref<1x1x256xf32, #tpu.memory_space<vmem>>, %arg5: memref<1x1x256xf32, #tpu.memory_space<vmem>>) attributes {dimension_semantics = [#tpu.dimension_semantics<parallel>, #tpu.dimension_semantics<arbitrary>], iteration_bounds = array<i64: 2, 1>, scalar_prefetch = 0 : i64, scratch_operands = 0 : i64, tpu.core_type = #tpu.core_type<tc>, window_params = [{transform_indices = @transform_0, window_bounds = array<i64: 1, 4, 256>}, {transform_indices = @transform_1, window_bounds = array<i64: 1, 1, 256>}, {transform_indices = @transform_2, window_bounds = array<i64: 1, 1, 256>}, {transform_indices = @transform_3, window_bounds = array<i64: 1, 1, 256>}]} {
    %c0_i32 = arith.constant 0 : i32
    %0 = arith.cmpi eq, %arg1, %c0_i32 : i32
    %1 = arith.extui %0 : i1 to i32
    %c0_i32_0 = arith.constant 0 : i32
    %2 = arith.cmpi ne, %1, %c0_i32_0 : i32
    scf.if %2 {
      %cst_27 = arith.constant 0.000000e+00 : f32
      %58 = vector.broadcast %cst_27 : f32 to vector<1x256xf32>
      %c0_28 = arith.constant 0 : index
      %c0_29 = arith.constant 0 : index
      %c0_30 = arith.constant 0 : index
      %59 = vector.load %arg4[%c0_28, %c0_29, %c0_30] : memref<1x1x256xf32, #tpu.memory_space<vmem>>, vector<1x1x256xf32>
      %60 = vector.shape_cast %59 : vector<1x1x256xf32> to vector<1x256xf32>
      %61 = vector.shape_cast %58 : vector<1x256xf32> to vector<1x1x256xf32>
      tpu.vector_store %arg4[%c0_28, %c0_29, %c0_30], %61 {strides = array<i32>} : memref<1x1x256xf32, #tpu.memory_space<vmem>>, vector<1x1x256xf32>,
      %cst_31 = arith.constant 0.000000e+00 : f32
      %62 = vector.broadcast %cst_31 : f32 to vector<1x256xf32>
      %c0_32 = arith.constant 0 : index
      %c0_33 = arith.constant 0 : index
      %c0_34 = arith.constant 0 : index
      %63 = vector.load %arg5[%c0_32, %c0_33, %c0_34] : memref<1x1x256xf32, #tpu.memory_space<vmem>>, vector<1x1x256xf32>
      %64 = vector.shape_cast %63 : vector<1x1x256xf32> to vector<1x256xf32>
      %65 = vector.shape_cast %62 : vector<1x256xf32> to vector<1x1x256xf32>
      tpu.vector_store %arg5[%c0_32, %c0_33, %c0_34], %65 {strides = array<i32>} : memref<1x1x256xf32, #tpu.memory_space<vmem>>, vector<1x1x256xf32>,
    } else {
    }
    %c0 = arith.constant 0 : index
    %c0_1 = arith.constant 0 : index
    %c0_2 = arith.constant 0 : index
    %3 = vector.load %arg2[%c0, %c0_1, %c0_2] : memref<1x4x256xf32, #tpu.memory_space<vmem>>, vector<1x4x256xf32>
    %4 = vector.shape_cast %3 : vector<1x4x256xf32> to vector<4x256xf32>
    %c0_3 = arith.constant 0 : index
    %c0_4 = arith.constant 0 : index
    %c0_5 = arith.constant 0 : index
    %5 = vector.load %arg3[%c0_3, %c0_4, %c0_5] : memref<1x1x256xi32, #tpu.memory_space<vmem>>, vector<1x1x256xi32>
    %6 = vector.shape_cast %5 : vector<1x1x256xi32> to vector<1x256xi32>
    %c255_i32 = arith.constant 255 : i32
    %7 = vector.broadcast %c255_i32 : i32 to vector<1x256xi32>
    %8 = arith.cmpi ne, %6, %7 : vector<1x256xi32>
    %c0_i32_6 = arith.constant 0 : i32
    %9 = vector.broadcast %c0_i32_6 : i32 to vector<1x256xi32>
    %10 = arith.select %8, %6, %9 : vector<1x256xi1>, vector<1x256xi32>
    %cst = arith.constant dense<0xFF800000> : vector<256xf32>
    %11 = vector.multi_reduction <maximumf>, %4, %cst [0] : vector<4x256xf32> to vector<256xf32>
    %12 = vector.shape_cast %11 : vector<256xf32> to vector<1x256xf32>
    %13 = vector.broadcast %12 : vector<1x256xf32> to vector<4x256xf32>
    %14 = arith.subf %4, %13 : vector<4x256xf32>
    %15 = math.exp %14 : vector<4x256xf32>
    %cst_7 = arith.constant dense<0.000000e+00> : vector<256xf32>
    %16 = vector.multi_reduction <add>, %15, %cst_7 [0] : vector<4x256xf32> to vector<256xf32>
    %17 = vector.shape_cast %16 : vector<256xf32> to vector<1x256xf32>
    %18 = tpu.reciprocal %17 : vector<1x256xf32> -> vector<1x256xf32>
    %19 = vector.broadcast %18 : vector<1x256xf32> to vector<4x256xf32>
    %20 = arith.mulf %15, %19 : vector<4x256xf32>
    %21 = tpu.iota {dimensions = array<i32: 0>} : vector<4x256xi32>
    %22 = vector.broadcast %10 : vector<1x256xi32> to vector<4x256xi32>
    %23 = arith.cmpi eq, %21, %22 : vector<4x256xi32>
    %cst_8 = arith.constant 1.000000e+00 : f32
    %24 = vector.broadcast %cst_8 : f32 to vector<4x256xf32>
    %25 = arith.subf %24, %20 : vector<4x256xf32>
    %26 = arith.select %23, %20, %25 : vector<4x256xi1>, vector<4x256xf32>
    %cst_9 = arith.constant 2.500000e-01 : f32
    %cst_10 = arith.constant 7.500000e-01 : f32
    %27 = vector.broadcast %cst_9 : f32 to vector<4x256xf32>
    %28 = vector.broadcast %cst_10 : f32 to vector<4x256xf32>
    %29 = arith.select %23, %27, %28 : vector<4x256xi1>, vector<4x256xf32>
    %cst_11 = arith.constant 1.000000e+00 : f32
    %30 = vector.broadcast %cst_11 : f32 to vector<4x256xf32>
    %31 = arith.subf %30, %26 : vector<4x256xf32>
    %32 = arith.mulf %31, %31 : vector<4x256xf32>
    %33 = arith.mulf %29, %32 : vector<4x256xf32>
    %cst_12 = arith.constant 0.000000e+00 : f32
    %34 = vector.broadcast %cst_12 : f32 to vector<4x256xf32>
    %35 = arith.subf %34, %33 : vector<4x256xf32>
    %cst_13 = arith.constant 9.99999996E-13 : f32
    %36 = vector.broadcast %cst_13 : f32 to vector<4x256xf32>
    %37 = arith.addf %26, %36 : vector<4x256xf32>
    %38 = math.log %37 : vector<4x256xf32>
    %39 = arith.mulf %35, %38 : vector<4x256xf32>
    %40 = arith.extui %8 : vector<1x256xi1> to vector<1x256xi32>
    %41 = arith.sitofp %40 : vector<1x256xi32> to vector<1x256xf32>
    %42 = vector.broadcast %41 : vector<1x256xf32> to vector<4x256xf32>
    %43 = arith.mulf %39, %42 : vector<4x256xf32>
    %c0_14 = arith.constant 0 : index
    %c0_15 = arith.constant 0 : index
    %c0_16 = arith.constant 0 : index
    %44 = vector.load %arg4[%c0_14, %c0_15, %c0_16] : memref<1x1x256xf32, #tpu.memory_space<vmem>>, vector<1x1x256xf32>
    %45 = vector.shape_cast %44 : vector<1x1x256xf32> to vector<1x256xf32>
    %cst_17 = arith.constant dense<0.000000e+00> : vector<256xf32>
    %46 = vector.multi_reduction <add>, %43, %cst_17 [0] : vector<4x256xf32> to vector<256xf32>
    %47 = vector.shape_cast %46 : vector<256xf32> to vector<1x256xf32>
    %48 = arith.addf %45, %47 : vector<1x256xf32>
    %c0_18 = arith.constant 0 : index
    %c0_19 = arith.constant 0 : index
    %c0_20 = arith.constant 0 : index
    %49 = vector.load %arg4[%c0_18, %c0_19, %c0_20] : memref<1x1x256xf32, #tpu.memory_space<vmem>>, vector<1x1x256xf32>
    %50 = vector.shape_cast %49 : vector<1x1x256xf32> to vector<1x256xf32>
    %51 = vector.shape_cast %48 : vector<1x256xf32> to vector<1x1x256xf32>
    tpu.vector_store %arg4[%c0_18, %c0_19, %c0_20], %51 {strides = array<i32>} : memref<1x1x256xf32, #tpu.memory_space<vmem>>, vector<1x1x256xf32>,
    %c0_21 = arith.constant 0 : index
    %c0_22 = arith.constant 0 : index
    %c0_23 = arith.constant 0 : index
    %52 = vector.load %arg5[%c0_21, %c0_22, %c0_23] : memref<1x1x256xf32, #tpu.memory_space<vmem>>, vector<1x1x256xf32>
    %53 = vector.shape_cast %52 : vector<1x1x256xf32> to vector<1x256xf32>
    %54 = arith.addf %53, %41 : vector<1x256xf32>
    %c0_24 = arith.constant 0 : index
    %c0_25 = arith.constant 0 : index
    %c0_26 = arith.constant 0 : index
    %55 = vector.load %arg5[%c0_24, %c0_25, %c0_26] : memref<1x1x256xf32, #tpu.memory_space<vmem>>, vector<1x1x256xf32>
    %56 = vector.shape_cast %55 : vector<1x1x256xf32> to vector<1x256xf32>
    %57 = vector.shape_cast %54 : vector<1x256xf32> to vector<1x1x256xf32>
    tpu.vector_store %arg5[%c0_24, %c0_25, %c0_26], %57 {strides = array<i32>} : memref<1x1x256xf32, #tpu.memory_space<vmem>>, vector<1x1x256xf32>,
    return
  }
  func.func @transform_0(%arg0: i32, %arg1: i32) -> (i32, i32, i32) {
    %c0_i32 = arith.constant 0 : i32
    %c0_i32_0 = arith.constant 0 : i32
    return %arg0, %c0_i32, %arg1 : i32, i32, i32
  }
  func.func @transform_1(%arg0: i32, %arg1: i32) -> (i32, i32, i32) {
    %c0_i32 = arith.constant 0 : i32
    %c0_i32_0 = arith.constant 0 : i32
    return %arg0, %c0_i32, %arg1 : i32, i32, i32
  }
  func.func @transform_2(%arg0: i32, %arg1: i32) -> (i32, i32, i32) {
    %c0_i32 = arith.constant 0 : i32
    %c0_i32_0 = arith.constant 0 : i32
    %c0_i32_1 = arith.constant 0 : i32
    return %arg0, %c0_i32, %c0_i32_0 : i32, i32, i32
  }
  func.func @transform_3(%arg0: i32, %arg1: i32) -> (i32, i32, i32) {
    %c0_i32 = arith.constant 0 : i32
    %c0_i32_0 = arith.constant 0 : i32
    %c0_i32_1 = arith.constant 0 : i32
    return %arg0, %c0_i32, %c0_i32_0 : i32, i32, i32
  }
}

</mosaic_0001>

<bundles_post_ra>
// kernel: tpu_custom_call.1
= control target key start
LH: loop header
LB: loop body
LE: loop exit
PB: predicated region body
PF: predicated region fallthrough
CT: control target
= control target key end

     0   :  { %9 = vsyncpa [#allocation3], 0  ;;  %s1212_s0 = inlined_call_operand.hbm [shape: f32[2,4,256], index: 0, kind: input, shape index: {}]   ;;  %s1213_s1 = inlined_call_operand.hbm [shape: s32[2,1,256], index: 1, kind: input, shape index: {}]   ;;  %s1214_s2 = inlined_call_operand.hbm [shape: f32[2,1,256], index: 2, kind: output, shape index: {0}]   ;;  %s1215_s3 = inlined_call_operand.hbm [shape: f32[2,1,256], index: 3, kind: output, shape index: {1}]  }
   0x1   :  { %11 = vsyncpa [#allocation3 + $0x1], 0 }
   0x2   :  { %12 = vsyncpa [#allocation6], 0 }
   0x3   :  { %14 = vsyncpa [#allocation6 + $0x1], 0 }
   0x4   :  { %15 = vsyncpa [#allocation4], 0 }
   0x5   :  { %17 = vsyncpa [#allocation4 + $0x1], 0 }
   0x6   :  { %18 = vsyncpa [#allocation9], 0 }
   0x7   :  { %20 = vsyncpa [#allocation9 + $0x1], 0  ;;  %s911_s12 = smov 0   ;;  %s913_s13 = smov 0  }
   0x8   :  { %s915_s14 = smov 0   ;;  %s917_s15 = smov 0  }
   0x9   :  { %s919_s16 = smov 0   ;;  %s921_s17 = smov 0  }
   0xa LB: > { %s590_s18 = sadd.s32 4294967295, %s882_s17   ;;  %s591_s19 = sadd.s32 4294967294, %s882_s17   ;;  %s882_s17 = sphi %s921_s17, %s26_s17   ;;  %s878_s16 = sphi %s919_s16, %s1237_s16   ;;  %s874_s15 = sphi %s917_s15, %s1236_s15   ;;  %s870_s14 = sphi %s915_s14, %s1235_s14   ;;  %s866_s13 = sphi %s913_s13, %s1234_s13   ;;  %s862_s12 = sphi %s911_s12, %s1233_s12  }
   0xb   : > { %s38_s20 = sadd.s32 1, %s878_s16  ;;  %s47_s21 = sadd.s32 1, %s870_s14 }
   0xc   : > { %p40_p0 = scmp.ge.s32.totalorder %s38_s20, 2  ;;  %p54_p1 = scmp.ne.s32.totalorder %s870_s14, %s866_s13 }
   0xd   : > { %p55_p2 = scmp.eq.s32.totalorder %s882_s17, 0  ;;  %p60_p3 = scmp.ne.s32.totalorder %s866_s13, %s862_s12 }
   0xe   : > { %s1239_s20 = smov (%p40_p0, %s38_s20), 0  ;;  %p61_p5 = scmp.eq.s32.totalorder %s590_s18, 0 }
   0xf   : > { %p952_p4 = por %p55_p2, %p54_p1  ;;  %s42_s23 = ssub.s32 %s878_s16, %s1239_s20 }
  0x10   : > { %p112_p6 = scmp.eq.s32.totalorder %s590_s18, 1  ;;  %p45_p7 = scmp.eq.s32.totalorder %s42_s23, 0 }
  0x11   : > { %p958_p8 = por %p61_p5, %p60_p3  ;;  %p118_p10 = scmp.eq.s32.totalorder %s591_s19, 1 }
  0x12   : > { %p962_p9 = por %p112_p6, %p54_p1  ;;  %p640_p13 = scmp.lt.s32.totalorder %s882_s17, 2 }
  0x13   : > { %s1219_s24 = scalar_select %p958_p8, 1, 0 }
  0x14   : > { %s1220_s25 = scalar_select %p962_p9, 1, 0 }
  0x15   : > { %s967_s26 = scalar_select %p45_p7, %s870_s14, %s47_s21  }
  0x16   : > { %p969_p11 = por %p118_p10, %p60_p3  ;;  %s976_s28 = sand.u32 1, %s870_s14  }
  0x17   : > { %s594_s29 = sshll.u32 %s976_s28, 3  ;;  %s614_s30 = sshll.u32 %s878_s16, 7 }
  0x18   : > { %s1221_s27 = scalar_select %p969_p11, 1, 0 }
  0x19   : > { %s983_s6 = scalar_lea.hbm %s1212_s0, %s614_s30  ;;  %s168_s7 = scalar_lea.vmem [#allocation2], %s594_s29 }
  0x1a   : > { %s178_s8 = sshll.u32 %s168_s7, 4  ;;  %p989_p0 = pnand %p640_p13, %p952_p4  ;;  %s985_s8 = int_to_ptr.vmem [resolvable:$true] %s178_s8 }
  0x1b   : > { %s165_s10 = scalar_lea.sflag [#allocation3], %s976_s28  ;;  %s704_s11 = scalar_lea.hbm %s983_s6, 128 }
  0x1c   : > { %p705_p3 = scmp.ne.s32.totalorder %s983_s6, %s704_s11  ;;  %p706_p5 = pneg %p989_p0 }
  0x1d   : > { %s709_s21 = scalar_lea.hbm %s1212_s0, 256  ;;  %p710_p4 = scmp.lt.u32.totalorder %s983_s6, %s1212_s0 }
  0x1e   : > { %p707_p6 = pnand %p706_p5, %p705_p3  ;;  %p711_p10 = scmp.lt.u32.totalorder %s709_s21, %s704_s11 }
  0x1f   : > { %p713_p12 = scmp.lt.u32.totalorder %s704_s11, %s983_s6 }
  0x20   : > { %p708_p7 = pneg %p707_p6  ;;  %p712_p13 = por %p711_p10, %p710_p4 }
  0x22   : > { %p714_p1 = por %p713_p12, %p712_p13 }
  0x24   : > { %p715_p2 = pnand %p714_p1, %p708_p7 }
  0x26   : > { %718 = shalt.err (!%p715_p2)
}
  0x27   : > { %s719_s29 = scalar_lea.vmem %s985_s8, 128  ;;  %s884_s30 = smov [#allocation2]  }
  0x28   : > { %p720_p3 = scmp.ne.s32.totalorder %s985_s8, %s719_s29  ;;  %s724_s4 = sshll.u32 %s884_s30, 4  ;;  %s725_s4 = int_to_ptr.vmem [resolvable:$false] %s724_s4 }
  0x29   : > { %s726_s5 = scalar_lea.vmem %s725_s4, 256  ;;  %p727_p9 = scmp.lt.s32.totalorder %s985_s8, %s725_s4 }
  0x2a   : > { %p722_p6 = pnand %p720_p3, %p706_p5  ;;  %p728_p4 = scmp.lt.s32.totalorder %s726_s5, %s719_s29 }
  0x2c   : > { %p723_p11 = pneg %p722_p6  ;;  %p729_p10 = por %p728_p4, %p727_p9 }
  0x2e   : > { %p730_p12 = pnand %p729_p10, %p723_p11 }
  0x30   : > { %733 = shalt.err (!%p730_p12)
}
  0x31   : > { %629 = dma.hbm_to_vmem [thread:$0]  (!%p989_p0), %s983_s6, 128, %s985_s8, %s165_s10  }
  0x32   : > { %p1223_p1 = scmp.lt.s32.totalorder %s882_s17, 3  ;;  %p1224_p2 = scmp.ge.s32.totalorder %s882_s17, 1 }
  0x33   : > { %s597_s11 = sshll.u32 %s976_s28, 1  ;;  %s615_s18 = sshll.u32 %s878_s16, 5 }
  0x34   : > { %p1025_p7 = pnand %p1224_p2, %p1223_p1  ;;  %s1034_s22 = scalar_lea.hbm %s1213_s1, %s615_s18 }
  0x35   : > { %s189_s23 = scalar_lea.vmem [#allocation5], %s597_s11  ;;  %s186_s6 = scalar_lea.sflag [#allocation6], %s976_s28 }
  0x36   : > { %s1225_s7 = scalar_select %p1025_p7, 1, 0 }
  0x37   : > { %s199_s29 = sshll.u32 %s189_s23, 4  ;;  %s734_s8 = scalar_lea.hbm %s1034_s22, 32  ;;  %s200_s29 = int_to_ptr.vmem [resolvable:$true] %s199_s29 }
  0x38   : > { %p735_p9 = scmp.ne.s32.totalorder %s1034_s22, %s734_s8  ;;  %s739_s4 = scalar_lea.hbm %s1213_s1, 64 }
  0x39   : > { %p740_p3 = scmp.lt.u32.totalorder %s1034_s22, %s1213_s1  ;;  %p741_p6 = scmp.lt.u32.totalorder %s739_s4, %s734_s8 }
  0x3a   : > { %p737_p11 = pnand %p735_p9, %p706_p5  ;;  %p743_p10 = scmp.lt.u32.totalorder %s734_s8, %s1034_s22 }
  0x3b   : > { %p742_p4 = por %p741_p6, %p740_p3 }
  0x3c   : > { %p738_p13 = pneg %p737_p11 }
  0x3d   : > { %p744_p12 = por %p743_p10, %p742_p4 }
  0x3f   : > { %p745_p1 = pnand %p744_p12, %p738_p13 }
  0x41   : > { %748 = shalt.err (!%p745_p1)
}
  0x42   : > { %s749_s28 = scalar_lea.vmem %s200_s29, 32  ;;  %s885_s11 = smov [#allocation5]  }
  0x43   : > { %p750_p2 = scmp.ne.s32.totalorder %s200_s29, %s749_s28  ;;  %s754_s19 = sshll.u32 %s885_s11, 4  ;;  %s755_s19 = int_to_ptr.vmem [resolvable:$false] %s754_s19 }
  0x44   : > { %s756_s21 = scalar_lea.vmem %s755_s19, 64  ;;  %p757_p8 = scmp.lt.s32.totalorder %s200_s29, %s755_s19 }
  0x45   : > { %p752_p9 = pnand %p750_p2, %p706_p5  ;;  %p758_p7 = scmp.lt.s32.totalorder %s756_s21, %s749_s28 }
  0x47   : > { %p753_p11 = pneg %p752_p9  ;;  %p759_p3 = por %p758_p7, %p757_p8 }
  0x49   : > { %p760_p6 = pnand %p759_p3, %p753_p11 }
  0x4b   : > { %763 = shalt.err (!%p760_p6)
}
  0x4c   : > { %632 = dma.hbm_to_vmem [thread:$0]  (!%p989_p0), %s1034_s22, 32, %s200_s29, %s186_s6  }
  0x4d   : > { %p1226_p13 = scmp.ne.s32.totalorder %s1225_s7, 0 }
  0x4e   : > { %s1059_s23 = sand.u32 (!%p1226_p13), 1, %s866_s13   ;;  %p1227_p5 = scmp.ne.s32.totalorder (!%p1226_p13), %s1219_s24, 0 }
  0x4f   : > { %208 = sbr.rel (%p1226_p13) target bundleno = 230 (0xe6), region = 28  ;;  %s601_s8 = sshll.u32 (!%p1226_p13), %s1059_s23, 3 }
  0x50   : > { %s211_s10 = scalar_lea.sflag (!%p1226_p13), [#allocation3], %s1059_s23  ;;  %s214_s30 = scalar_lea.vmem (!%p1226_p13), [#allocation2], %s601_s8 }
  0x56   : > { %845 = dma.done.wait (%p1227_p5), %s211_s10, 128  }
  0x57   : > { %847 = vsyncadd (%p1227_p5), %s211_s10, 4294967168  ;;  %s602_s9 = sshll.u32 %s1059_s23, 1  ;;  %s220_s7 = scalar_lea.sflag [#allocation6], %s1059_s23 }
  0x58   : > { %s223_s22 = scalar_lea.vmem [#allocation5], %s602_s9 }
  0x59   : > { %849 = dma.done.wait (%p1227_p5), %s220_s7, 32  }
  0x5a   : > { %851 = vsyncadd (%p1227_p5), %s220_s7, 4294967264  ;;  %v262_v0 = vlaneseq  ;;  %s1077_s29 = scalar_lea.vmem [#allocation7], %s602_s9  ;;  %v886_v2 = vmov 0.0   ;;  %s255_s6 = scalar_lea.vmem [#allocation8], %s602_s9  ;;  %vm275_vm1 = vcmask 1043456   ;;  %v268_v4 = vld [vmem:[%s214_s30] sm:$0xff] }
  0x5b   : > { %v1086_v5 = vld [vmem:[%s223_s22] sm:$0x3]  ;;  %v273_v6 = vcombine.high %v268_v4, %v268_v4  ;;  %v276_v7 = vsel %vm275_vm1, %v268_v4, -inf  ;;  %s616_s24 = sshll.u32 %s874_s15, 5  ;;  %s451_s4 = sshll.u32 %s255_s6, 4  ;;  %s1111_s4 = int_to_ptr.vmem [resolvable:$true] %s451_s4 }
  0x5c   : > { %vm1073_vm0 = vcmp.lt.s32.totalorder %v262_v0, 256  ;;  %v1084_v3 = vshrl.u32 %v262_v0, 7  ;;  %vm270_vm2 = vcmp.ne.s32.totalorder %v1086_v5, 255  ;;  %v277_v9 = vrot.slane %v276_v7, 4  ;;  %s1109_s28 = scalar_lea.hbm %s1215_s3, %s616_s24  ;;  %s423_s11 = scalar_lea.sflag [#allocation9], %s1059_s23 }
  0x5d   : > { %266 = vst.msk [vmem:[%s1077_s29] sm:$0x3] %vm1073_vm0, %v886_v2  ;;  %267 = vst.msk [vmem:[%s255_s6] sm:$0x3] %vm1073_vm0, %v886_v2  ;;  %v605_v11 = vsel %vm270_vm2, 1.0, %v886_v2  ;;  %v283_v12 = vsel %vm275_vm1, %v273_v6, -inf }
  0x5e   : > { %v325_v8 = vsub.s32 0, %v1084_v3  ;;  %v329_v10 = vsub.s32 1, %v1084_v3  ;;  %v278_v15 = vmax.f32 %v276_v7, %v277_v9  ;;  %v284_v16 = vrot.slane %v283_v12, 4  ;;  %s764_s19 = scalar_lea.vmem %s1111_s4, 32  ;;  %p1230_p0 = scmp.ne.s32.totalorder %s1220_s25, 0 }
  0x5f   : > { %p765_p8 = scmp.ne.s32.totalorder %s1111_s4, %s764_s19  ;;  %s887_s21 = smov [#allocation8]  }
  0x60   : > { %v1098_v13 = vrot.slane %v605_v11, %v325_v8  ;;  %v1102_v17 = vrot.slane %v605_v11, %v329_v10  ;;  %v279_v19 = vrot.slane %v278_v15, 2  ;;  %v285_v20 = vmax.f32 %v283_v12, %v284_v16  ;;  %s768_s8 = sshll.u32 %s887_s21, 4  ;;  %s769_s8 = int_to_ptr.vmem [resolvable:$false] %s768_s8 }
  0x61   : > { %p766_p7 = pnand %p765_p8, %p1230_p0  ;;  %s770_s10 = scalar_lea.vmem %s769_s8, 64 }
  0x62   : > { %p771_p10 = scmp.lt.s32.totalorder %s1111_s4, %s769_s8  ;;  %p772_p12 = scmp.lt.s32.totalorder %s770_s10, %s764_s19 }
  0x63   : > { %p767_p4 = pneg %p766_p7 }
  0x64   : > { %v414_v14 = vld [vmem:[%s255_s6] sm:$0x3]  ;;  %p773_p1 = por %p772_p12, %p771_p10 }
  0x65   : > { %v415_v18 = vadd.f32 %v605_v11, %v414_v14 }
  0x66   : > { %p774_p2 = pnand %p773_p1, %p767_p4 }
  0x67   : > { %416 = vst.msk [vmem:[%s255_s6] sm:$0x3] %vm1073_vm0, %v415_v18 }
  0x68   : > { %777 = shalt.err (!%p774_p2)
}
  0x69   : > { %s778_s30 = scalar_lea.hbm %s1109_s28, 32  ;;  %s782_s22 = scalar_lea.hbm %s1215_s3, 64 }
  0x6a   : > { %p779_p9 = scmp.ne.s32.totalorder %s1109_s28, %s778_s30  ;;  %p783_p6 = scmp.lt.u32.totalorder %s1109_s28, %s1215_s3 }
  0x6b   : > { %p784_p13 = scmp.lt.u32.totalorder %s782_s22, %s778_s30  ;;  %p786_p8 = scmp.lt.u32.totalorder %s778_s30, %s1109_s28 }
  0x6c   : > { %p780_p11 = pnand %p779_p9, %p1230_p0 }
  0x6d   : > { %p785_p5 = por %p784_p13, %p783_p6 }
  0x6e   : > { %p781_p3 = pneg %p780_p11 }
  0x6f   : > { %p787_p7 = por %p786_p8, %p785_p5 }
  0x71   : > { %p788_p4 = pnand %p787_p7, %p781_p3 }
  0x73   : > { %791 = shalt.err (!%p788_p4)
}
  0x74   : > { %623 = dma.vmem_to_hbm [thread:$0]  (%p1230_p0), %s1111_s4, 32, %s1109_s28, %s423_s11   ;;  %v280_v21 = vmax.f32 %v278_v15, %v279_v19  ;;  %v286_v22 = vrot.slane %v285_v20, 2  ;;  %v271_v47 = vsel %vm270_vm2, %v1086_v5, 0  ;;  %v888_v0 = vmov 0.75  }
  0x75   : > { %v326_v50 = vrot.slane %v271_v47, %v325_v8  ;;  %v330_v52 = vrot.slane %v271_v47, %v329_v10  ;;  %s437_s4 = sshll.u32 %s1077_s29, 4  ;;  %s1160_s11 = scalar_lea.hbm %s1214_s2, %s616_s24  ;;  %s1162_s4 = int_to_ptr.vmem [resolvable:$true] %s437_s4 }
  0x76   : > { %v281_v23 = vrot.slane %v280_v21, 1  ;;  %v287_v24 = vmax.f32 %v285_v20, %v286_v22  ;;  %s418_s19 = scalar_lea.sflag [#allocation4], %s1059_s23  ;;  %s792_s21 = scalar_lea.vmem %s1162_s4, 32 }
  0x77   : > { %vm331_vm3 = vcmp.eq.s32.totalorder %v1084_v3, %v326_v50  ;;  %vm332_vm4 = vcmp.eq.s32.totalorder %v1084_v3, %v330_v52  ;;  %p793_p10 = scmp.ne.s32.totalorder %s1162_s4, %s792_s21  ;;  %s890_s15 = smov [#allocation7]  }
  0x78   : > { %v282_v25 = vmax.f32 %v280_v21, %v281_v23  ;;  %v288_v26 = vrot.slane %v287_v24, 1  ;;  %v342_v2 = vsel %vm331_vm3, 0.25, %v888_v0  ;;  %v343_v5 = vsel %vm332_vm4, 0.25, %v888_v0  ;;  %s796_s8 = sshll.u32 %s890_s15, 4  ;;  %s797_s8 = int_to_ptr.vmem [resolvable:$false] %s796_s8 }
  0x79   : > { %p794_p12 = pnand %p793_p10, %p1230_p0  ;;  %s798_s10 = scalar_lea.vmem %s797_s8, 64 }
  0x7a   : > { %v289_v27 = vmax.f32 %v287_v24, %v288_v26  ;;  %p799_p2 = scmp.lt.s32.totalorder %s1162_s4, %s797_s8  ;;  %p800_p9 = scmp.lt.s32.totalorder %s798_s10, %s792_s21 }
  0x7b   : > { %p795_p1 = pneg %p794_p12 }
  0x7c   : > { %v292_v28 = vcombine.low %v282_v25, %v289_v27  ;;  %v889_v27 = vmov 1966171168   ;;  %p801_p11 = por %p800_p9, %p799_p2 }
  0x7e   : > { %v294_v29 = vsub.f32 %v268_v4, %v292_v28  ;;  %v394_v28 = vunpack.c.l.s4 %v889_v27  ;;  %p802_p3 = pnand %p801_p11, %p795_p1 }
  0x80   : > { %v295_v30 = vmul.f32 1.442695, %v294_v29 }
  0x82   : > { %694 = vpow2.f32 %v295_v30 }
  0x8c   : > { %v695_v31 = vpop.eup %694 }
  0x8d   : > { %v298_v32 = vcombine.high %v695_v31, %v695_v31  ;;  %v300_v33 = vsel %vm275_vm1, %v695_v31, 0.0 }
  0x8e   : > { %v301_v34 = vrot.slane %v300_v33, 4 }
  0x8f   : > { %v307_v35 = vsel %vm275_vm1, %v298_v32, 0.0 }
  0x90   : > { %v302_v36 = vadd.f32 %v301_v34, %v300_v33  ;;  %v308_v37 = vrot.slane %v307_v35, 4 }
  0x92   : > { %v303_v38 = vrot.slane %v302_v36, 2  ;;  %v309_v39 = vadd.f32 %v308_v37, %v307_v35 }
  0x94   : > { %v304_v40 = vadd.f32 %v303_v38, %v302_v36  ;;  %v310_v41 = vrot.slane %v309_v39, 2  ;;  %v375_v38 = vld [vmem:[%s1077_s29] sm:$0x3] }
  0x96   : > { %v305_v42 = vrot.slane %v304_v40, 1  ;;  %v311_v43 = vadd.f32 %v310_v41, %v309_v39 }
  0x98   : > { %v306_v44 = vadd.f32 %v305_v42, %v304_v40  ;;  %v312_v45 = vrot.slane %v311_v43, 1 }
  0x9a   : > { %v313_v46 = vadd.f32 %v312_v45, %v311_v43  ;;  %696 = vrcp.f32 %v306_v44 }
  0x9c   : > { %698 = vrcp.f32 %v313_v46 }
  0xa4   : > { %v697_v48 = vpop.eup %696 }
  0xa6   : > { %v699_v49 = vpop.eup %698 }
  0xa7   : > { %v318_v51 = vcombine.low %v697_v48, %v699_v49 }
  0xa9   : > { %v320_v53 = vmul.f32 %v695_v31, %v318_v51  ;;  %v395_v31 = vunpack.c.0.s8 %v394_v28 }
  0xab   : > { %v333_v54 = vsub.f32 1.0, %v320_v53  ;;  %v335_v55 = vcombine.high %v320_v53, %v320_v53  ;;  %v398_v35 = vsub.s32 %v395_v31, %v1084_v3 }
  0xad   : > { %v338_v56 = vcombine.high %v333_v54, %v333_v54  ;;  %v340_v57 = vsel %vm331_vm3, %v320_v53, %v333_v54 }
  0xae   : > { %v344_v58 = vsub.f32 1.0, %v340_v57  ;;  %v352_v59 = vadd.f32 1e-12, %v340_v57 }
  0xaf   : > { %v341_v60 = vsel %vm332_vm4, %v335_v55, %v338_v56 }
  0xb0   : > { %v345_v61 = vsub.f32 1.0, %v341_v60  ;;  %v353_v62 = vadd.f32 1e-12, %v341_v60  ;;  %700 = vlog2.f32 %v352_v59  ;;  %v346_v63 = vmul.f32 %v344_v58, %v344_v58 }
  0xb2   : > { %702 = vlog2.f32 %v353_v62  ;;  %v347_v4 = vmul.f32 %v345_v61, %v345_v61  ;;  %v348_v6 = vmul.f32 %v346_v63, %v342_v2 }
  0xb4   : > { %v349_v7 = vmul.f32 %v347_v4, %v343_v5  ;;  %v350_v8 = vsub.f32 0.0, %v348_v6 }
  0xb6   : > { %v351_v10 = vsub.f32 0.0, %v349_v7 }
  0xba   : > { %v701_v9 = vpop.eup %700 }
  0xbb   : > { %v355_v11 = vmul.f32 0.6931472, %v701_v9 }
  0xbc   : > { %v703_v12 = vpop.eup %702 }
  0xbd   : > { %v357_v14 = vmul.f32 0.6931472, %v703_v12  ;;  %v358_v15 = vmul.f32 %v355_v11, %v350_v8 }
  0xbf   : > { %v359_v16 = vmul.f32 %v357_v14, %v351_v10  ;;  %v373_v18 = vmul.f32 %v1098_v13, %v358_v15 }
  0xc1   : > { %v374_v19 = vmul.f32 %v1102_v17, %v359_v16  ;;  %v376_v20 = vsel %vm275_vm1, %v373_v18, 0.0 }
  0xc2   : > { %v377_v21 = vrot.slane %v376_v20, 4 }
  0xc3   : > { %v383_v22 = vsel %vm275_vm1, %v374_v19, 0.0 }
  0xc4   : > { %v378_v23 = vadd.f32 %v377_v21, %v376_v20  ;;  %v384_v24 = vrot.slane %v383_v22, 4 }
  0xc6   : > { %v379_v25 = vrot.slane %v378_v23, 2  ;;  %v385_v26 = vadd.f32 %v384_v24, %v383_v22 }
  0xc8   : > { %v380_v29 = vadd.f32 %v379_v25, %v378_v23  ;;  %v386_v30 = vrot.slane %v385_v26, 2 }
  0xca   : > { %v381_v13 = vrot.slane %v380_v29, 1  ;;  %v387_v17 = vadd.f32 %v386_v30, %v385_v26 }
  0xcc   : > { %v382_v32 = vadd.f32 %v381_v13, %v380_v29  ;;  %v388_v33 = vrot.slane %v387_v17, 1 }
  0xce   : > { %v389_v34 = vadd.f32 %v388_v33, %v387_v17 }
  0xd0   : > { %v392_v36 = vcombine.low %v382_v32, %v389_v34 }
  0xd2   : > { %v399_v37 = vrot.slane %v392_v36, %v398_v35 }
  0xd4   : > { %v406_v39 = vrot.slane %v399_v37, %v398_v35 }
  0xd6   : > { %v408_v40 = vadd.f32 %v406_v39, %v375_v38 }
  0xd8   : > { %413 = vst.msk [vmem:[%s1077_s29] sm:$0x3] %vm1073_vm0, %v408_v40 }
  0xd9   : > { %805 = shalt.err (!%p802_p3)
}
  0xda   : > { %s806_s23 = scalar_lea.hbm %s1160_s11, 32  ;;  %s810_s30 = scalar_lea.hbm %s1214_s2, 64 }
  0xdb   : > { %p807_p6 = scmp.ne.s32.totalorder %s1160_s11, %s806_s23  ;;  %p811_p8 = scmp.lt.u32.totalorder %s1160_s11, %s1214_s2 }
  0xdc   : > { %p812_p7 = scmp.lt.u32.totalorder %s810_s30, %s806_s23  ;;  %p814_p10 = scmp.lt.u32.totalorder %s806_s23, %s1160_s11 }
  0xdd   : > { %p808_p13 = pnand %p807_p6, %p1230_p0 }
  0xde   : > { %p813_p4 = por %p812_p7, %p811_p8 }
  0xdf   : > { %p809_p5 = pneg %p808_p13 }
  0xe0   : > { %p815_p12 = por %p814_p10, %p813_p4 }
  0xe2   : > { %p816_p1 = pnand %p815_p12, %p809_p5 }
  0xe4   : > { %819 = shalt.err (!%p816_p1)
}
  0xe5   : > { %622 = dma.vmem_to_hbm [thread:$0]  (%p1230_p0), %s1162_s4, 32, %s1160_s11, %s418_s19  }
  0xe6 PF: > { %s463_s22 = sand.u32 1, %s862_s12   ;;  %p1231_p2 = scmp.ne.s32.totalorder %s1221_s27, 0 }
  0xe7   : > { %p1232_p9 = scmp.ge.s32.totalorder %s882_s17, 2  ;;  %s464_s6 = scalar_lea.sflag [#allocation4], %s463_s22 }
  0xe9   : > { %p634_p11 = pnand %p1232_p9, %p1231_p2 }
  0xeb   : > { %853 = dma.done.wait (!%p634_p11), %s464_s6, 32  }
  0xec   : > { %855 = vsyncadd (!%p634_p11), %s464_s6, 4294967264  ;;  %s473_s5 = scalar_lea.sflag [#allocation9], %s463_s22 }
  0xed   : > { %857 = dma.done.wait (!%p634_p11), %s473_s5, 32  }
  0xee   : > { %859 = vsyncadd (!%p634_p11), %s473_s5, 4294967264  ;;  %s26_s17 = sadd.s32 1, %s882_s17   ;;  %s1233_s12 = smov %s866_s13 }
  0xef   : > { %p23_p3 = scmp.ge.s32.totalorder %s26_s17, 4   ;;  %s1234_s13 = smov %s870_s14 }
  0xf0   : > { %s1235_s14 = smov %s967_s26  ;;  %s1236_s15 = smov %s878_s16 }
  0xf1   : > { %s1237_s16 = smov %s1239_s20  ;;  %25 = sbr.rel (!%p23_p3) target bundleno = 10 (0xa), region = 107 }
  0xf8   :  { %478 = vsyncpa [#allocation3], 1 }
  0xf9   :  { %480 = vsyncpa [#allocation3 + $0x1], 1 }
  0xfa   :  { %481 = vsyncpa [#allocation6], 1 }
  0xfb   :  { %483 = vsyncpa [#allocation6 + $0x1], 1 }
  0xfc   :  { %484 = vsyncpa [#allocation4], 1 }
  0xfd   :  { %486 = vsyncpa [#allocation4 + $0x1], 1 }
  0xfe   :  { %487 = vsyncpa [#allocation9], 1 }
  0xff   :  { %489 = vsyncpa [#allocation9 + $0x1], 1 }

</bundles_post_ra>
